<compile_context>
chip_gen: v7x
topology: tpu7x:2x2x1
jax: 0.10.0
libtpu: 0.0.40
codegen_flags: <defaults>
</compile_context>

<pallas_src>
import functools

import jax
import jax.numpy as jnp
from jax.experimental import pallas as pl
from jax.experimental.pallas import tpu as pltpu


def _round_up(x, m):
    return (x + m - 1) // m * m


def _sublane_multiple(dtype):
    # min sublane tiling: 8 rows for 32-bit, 16 for 16-bit, 32 for 8-bit dtypes
    return {4: 8, 2: 16, 1: 32}.get(jnp.dtype(dtype).itemsize, 8)


def _vmem_capacity_bytes():
    try:
        return int(pltpu.get_tpu_info().vmem_capacity_bytes)
    except Exception:
        return 64 * 1024 * 1024  # conservative (v7x per-TC); safe on v5e/v6e too


# ----------------------------------------------------------------------------- kernels
def _ffn_resident_kernel(x_ref, w1_ref, b1_ref, w2_ref, b2_ref, o_ref):
    # x_ref:  (tm, D_in_p)      streamed input tile
    # w1_ref: (D_in_p, D_bn_p)  resident fc_1 weight (transposed, zero-padded)
    # b1_ref: (1, D_bn_p)
    # w2_ref: (D_bn_p, D_in_p)  resident fc_2 weight (transposed, zero-padded)
    # b2_ref: (1, D_in_p)
    # o_ref:  (tm, D_in_p)
    x = x_ref[...]
    h = jnp.dot(x, w1_ref[...], preferred_element_type=jnp.float32)
    h = jnp.maximum(h + b1_ref[...].astype(jnp.float32), 0.0)     # bias + ReLU in f32
    # dropout: identity in eval mode
    y = jnp.dot(h.astype(w2_ref.dtype), w2_ref[...],
                preferred_element_type=jnp.float32)
    o_ref[...] = (y + b2_ref[...].astype(jnp.float32)).astype(o_ref.dtype)


def _ffn_chunked_kernel(x_ref, w1_ref, b1_ref, w2_ref, b2_ref, o_ref, acc_ref):
    # grid = (m_tiles, bn_chunks); bn axis is the reduction ("arbitrary") axis.
    # x_ref:  (tm, D_in_p)   constant over bn -> fetched once per m tile
    # w1_ref: (D_in_p, tbn)  streamed bottleneck chunk of fc_1
    # b1_ref: (1, tbn)
    # w2_ref: (tbn, D_in_p)  streamed bottleneck chunk of fc_2
    # b2_ref: (1, D_in_p)    resident (Buffered(1))
    # acc_ref: (tm, D_in_p) f32 accumulator scratch
    k = pl.program_id(1)

    @pl.when(k == 0)
    def _():
        acc_ref[...] = jnp.broadcast_to(b2_ref[...].astype(jnp.float32),
                                        acc_ref.shape)

    h = jnp.dot(x_ref[...], w1_ref[...], preferred_element_type=jnp.float32)
    h = jnp.maximum(h + b1_ref[...].astype(jnp.float32), 0.0)
    acc_ref[...] += jnp.dot(h.astype(w2_ref.dtype), w2_ref[...],
                            preferred_element_type=jnp.float32)

    @pl.when(k == pl.num_programs(1) - 1)
    def _():
        o_ref[...] = acc_ref[...].astype(o_ref.dtype)


# ----------------------------------------------------------------------------- wrapper
def prepare_ffn_params(w1, b1, w2, b2):
    """Pad + transpose parameters ONCE (weights are static across calls).

    w1: (bottleneck, input_dim)   torch nn.Linear layout of fc_1.weight
    b1: (bottleneck,)
    w2: (input_dim, bottleneck)   fc_2.weight
    b2: (input_dim,)
    Returns (w1_p, b1_p, w2_p, b2_p) zero-padded to 128-lane multiples, with
    weights transposed to (in, out) layout for the kernel.
    """
    d_bn, d_in = w1.shape
    d_in_p = _round_up(d_in, 128)
    d_bn_p = _round_up(d_bn, 128)
    w1_p = jnp.pad(w1.T, ((0, d_in_p - d_in), (0, d_bn_p - d_bn)))
    w2_p = jnp.pad(w2.T, ((0, d_bn_p - d_bn), (0, d_in_p - d_in)))
    b1_p = jnp.pad(b1.reshape(1, d_bn), ((0, 0), (0, d_bn_p - d_bn)))
    b2_p = jnp.pad(b2.reshape(1, d_in), ((0, 0), (0, d_in_p - d_in)))
    return w1_p, b1_p, w2_p, b2_p


@functools.partial(jax.jit, static_argnames=("tm", "tbn", "force_path"))
def feed_forward(x, w1_p, b1_p, w2_p, b2_p, *, tm=512, tbn=512, force_path=None):
    """x: (..., input_dim); params from prepare_ffn_params(). Returns x's shape/dtype."""
    orig_shape = x.shape
    d_in = orig_shape[-1]
    d_in_p, d_bn_p = w1_p.shape
    assert d_in_p == _round_up(d_in, 128), "params not prepared for this input_dim"

    x2 = x.reshape(-1, d_in)
    m = x2.shape[0]
    sub = _sublane_multiple(x.dtype)
    itemsize = jnp.dtype(x.dtype).itemsize
    w_itemsize = jnp.dtype(w1_p.dtype).itemsize

    # dtype-aware row tile, never bigger than the (sublane-padded) problem
    tm_eff = max(sub, min(_round_up(tm, sub), _round_up(m, sub)))

    vmem_cap = _vmem_capacity_bytes()
    budget = int(0.70 * vmem_cap)  # leave headroom for compiler-internal scratch

    resident_w_bytes = ((w1_p.size + w2_p.size) * w_itemsize
                        + (b1_p.size + b2_p.size) * w_itemsize)

    def resident_total(tm_):
        stream = 2 * 2 * tm_ * d_in_p * itemsize           # x + out, double-buffered
        interm = 4 * tm_ * (d_bn_p + d_in_p)                # live f32 h / y values
        return stream + resident_w_bytes + interm

    use_resident = resident_w_bytes <= int(0.45 * vmem_cap)
    if force_path is not None:
        use_resident = (force_path == "resident")

    if use_resident:
        while resident_total(tm_eff) > budget and tm_eff > sub:
            tm_eff = max(sub, _round_up(tm_eff // 2, sub))
        m_p = _round_up(m, tm_eff)
        vmem_bytes = min(max(int(1.25 * resident_total(tm_eff)), 8 << 20), budget)

        need_pad = (m_p != m) or (d_in_p != d_in)
        x_in = jnp.pad(x2, ((0, m_p - m), (0, d_in_p - d_in))) if need_pad else x2

        out = pl.pallas_call(
            _ffn_resident_kernel,
            out_shape=jax.ShapeDtypeStruct((m_p, d_in_p), x.dtype),
            grid_spec=pltpu.PrefetchScalarGridSpec(
                num_scalar_prefetch=0,
                grid=(m_p // tm_eff,),
                in_specs=[
                    pl.BlockSpec((tm_eff, d_in_p), lambda i: (i, 0)),
                    pl.BlockSpec((d_in_p, d_bn_p), lambda i: (0, 0),
                                 pipeline_mode=pl.Buffered(1)),
                    pl.BlockSpec((1, d_bn_p), lambda i: (0, 0),
                                 pipeline_mode=pl.Buffered(1)),
                    pl.BlockSpec((d_bn_p, d_in_p), lambda i: (0, 0),
                                 pipeline_mode=pl.Buffered(1)),
                    pl.BlockSpec((1, d_in_p), lambda i: (0, 0),
                                 pipeline_mode=pl.Buffered(1)),
                ],
                out_specs=pl.BlockSpec((tm_eff, d_in_p), lambda i: (i, 0)),
            ),
            compiler_params=pltpu.CompilerParams(
                dimension_semantics=("parallel",),
                vmem_limit_bytes=vmem_bytes,
            ),
        )(x_in, w1_p, b1_p, w2_p, b2_p)
    else:
        # Chunked-bottleneck fallback: weights streamed in d_bn chunks, f32 accumulator.
        tbn_eff = max(128, min(_round_up(tbn, 128), d_bn_p))
        while d_bn_p % tbn_eff != 0:          # keep the bn grid exact (no OOB blocks)
            tbn_eff -= 128

        def chunked_total(tm_, tbn_):
            stream = 2 * 2 * tm_ * d_in_p * itemsize                         # x + out
            w_stream = 2 * (2 * d_in_p * tbn_ + tbn_) * w_itemsize           # W1/W2/b1 chunks, 2 bufs
            resident = d_in_p * w_itemsize                                   # b2
            acc = 4 * tm_ * d_in_p
            interm = 4 * tm_ * (tbn_ + d_in_p)
            return stream + w_stream + resident + acc + interm

        while chunked_total(tm_eff, tbn_eff) > budget and (tm_eff > sub or tbn_eff > 128):
            if tbn_eff > 128 and d_bn_p % (tbn_eff // 2) == 0 and tbn_eff % 256 == 0:
                tbn_eff //= 2
            elif tm_eff > sub:
                tm_eff = max(sub, _round_up(tm_eff // 2, sub))
            else:
                break
        m_p = _round_up(m, tm_eff)
        vmem_bytes = min(max(int(1.25 * chunked_total(tm_eff, tbn_eff)), 8 << 20), budget)

        need_pad = (m_p != m) or (d_in_p != d_in)
        x_in = jnp.pad(x2, ((0, m_p - m), (0, d_in_p - d_in))) if need_pad else x2

        out = pl.pallas_call(
            _ffn_chunked_kernel,
            out_shape=jax.ShapeDtypeStruct((m_p, d_in_p), x.dtype),
            grid_spec=pltpu.PrefetchScalarGridSpec(
                num_scalar_prefetch=0,
                grid=(m_p // tm_eff, d_bn_p // tbn_eff),
                in_specs=[
                    pl.BlockSpec((tm_eff, d_in_p), lambda i, k: (i, 0)),
                    pl.BlockSpec((d_in_p, tbn_eff), lambda i, k: (0, k)),
                    pl.BlockSpec((1, tbn_eff), lambda i, k: (0, k)),
                    pl.BlockSpec((tbn_eff, d_in_p), lambda i, k: (k, 0)),
                    pl.BlockSpec((1, d_in_p), lambda i, k: (0, 0),
                                 pipeline_mode=pl.Buffered(1)),
                ],
                out_specs=pl.BlockSpec((tm_eff, d_in_p), lambda i, k: (i, 0)),
                scratch_shapes=[pltpu.VMEM((tm_eff, d_in_p), jnp.float32)],
            ),
            compiler_params=pltpu.CompilerParams(
                dimension_semantics=("parallel", "arbitrary"),
                vmem_limit_bytes=vmem_bytes,
            ),
        )(x_in, w1_p, b1_p, w2_p, b2_p)

    if need_pad:
        out = out[:m, :d_in]
    return out.reshape(orig_shape)


# ----------------------------------------------------------------------------- demo
def _init_linear(key, in_dim, out_dim, dtype=jnp.float32):
    """Deterministic init mimicking nn.Linear (uniform(-1/sqrt(in), 1/sqrt(in)))."""
    kw, kb = jax.random.split(key)
    bound = 1.0 / (in_dim ** 0.5)
    w = jax.random.uniform(kw, (out_dim, in_dim), dtype, -bound, bound)  # (out, in) like torch
    b = jax.random.uniform(kb, (out_dim,), dtype, -bound, bound)
    return w, b


if __name__ == "__main__":
    # --- Test 1: resident-weights path (typical tiny adapter) -------------------------
    seq, batch = 8, 2
    input_dim, bottleneck_dim = 32, 16
    key = jax.random.PRNGKey(0)
    k_x, k_fc1, k_fc2 = jax.random.split(key, 3)

    x = jax.random.normal(k_x, (seq, batch, input_dim), jnp.float32)
    w1, b1 = _init_linear(k_fc1, input_dim, bottleneck_dim)   # fc_1: (bn, in), (bn,)
    w2, b2 = _init_linear(k_fc2, bottleneck_dim, input_dim)   # fc_2: (in, bn), (in,)

    params = prepare_ffn_params(w1, b1, w2, b2)               # pad/transpose ONCE
    out = jax.block_until_ready(feed_forward(x, *params))

    ref = jnp.maximum(x @ w1.T + b1, 0.0) @ w2.T + b2
    assert out.shape == x.shape
    assert jnp.allclose(out, ref, atol=1e-5, rtol=1e-5), "resident path mismatch"

    # --- Test 2: chunked-bottleneck fallback (forced), multi-chunk accumulation -------
    seq2, batch2 = 24, 4
    input_dim2, bottleneck_dim2 = 128, 256                    # lane-aligned -> no-pad fast path
    k_x2, k_fc1b, k_fc2b = jax.random.split(jax.random.PRNGKey(1), 3)

    x2 = jax.random.normal(k_x2, (seq2, batch2, input_dim2), jnp.float32)
    w1b, b1b = _init_linear(k_fc1b, input_dim2, bottleneck_dim2)
    w2b, b2b = _init_linear(k_fc2b, bottleneck_dim2, input_dim2)

    params2 = prepare_ffn_params(w1b, b1b, w2b, b2b)
    out2 = jax.block_until_ready(
        feed_forward(x2, *params2, tbn=128, force_path="chunked"))

    ref2 = jnp.maximum(x2 @ w1b.T + b1b, 0.0) @ w2b.T + b2b
    assert out2.shape == x2.shape
    assert jnp.allclose(out2, ref2, atol=1e-4, rtol=1e-4), "chunked path mismatch"

    print("KERNEL_OK")
</pallas_src>

<mosaic_0001>
module attributes {stable_mosaic.version = 11 : i64} {
  func.func @_ffn_resident_kernel(%arg0: i32, %arg1: memref<16x128xf32, #tpu.memory_space<vmem>>, %arg2: memref<128x128xf32, #tpu.memory_space<vmem>>, %arg3: memref<1x128xf32, #tpu.memory_space<vmem>>, %arg4: memref<128x128xf32, #tpu.memory_space<vmem>>, %arg5: memref<1x128xf32, #tpu.memory_space<vmem>>, %arg6: memref<16x128xf32, #tpu.memory_space<vmem>>) attributes {dimension_semantics = [#tpu.dimension_semantics<parallel>], iteration_bounds = array<i64: 1>, scalar_prefetch = 0 : i64, scratch_operands = 0 : i64, tpu.core_type = #tpu.core_type<tc>, window_params = [{transform_indices = @transform_0, window_bounds = array<i64: 16, 128>}, {pipeline_mode = #tpu.pipeline_mode<synchronous>, transform_indices = @transform_1, window_bounds = array<i64: 128, 128>}, {pipeline_mode = #tpu.pipeline_mode<synchronous>, transform_indices = @transform_2, window_bounds = array<i64: 1, 128>}, {pipeline_mode = #tpu.pipeline_mode<synchronous>, transform_indices = @transform_3, window_bounds = array<i64: 128, 128>}, {pipeline_mode = #tpu.pipeline_mode<synchronous>, transform_indices = @transform_4, window_bounds = array<i64: 1, 128>}, {transform_indices = @transform_5, window_bounds = array<i64: 16, 128>}]} {
    %c0 = arith.constant 0 : index
    %c0_0 = arith.constant 0 : index
    %0 = vector.load %arg1[%c0, %c0_0] : memref<16x128xf32, #tpu.memory_space<vmem>>, vector<16x128xf32>
    %c0_1 = arith.constant 0 : index
    %c0_2 = arith.constant 0 : index
    %1 = vector.load %arg2[%c0_1, %c0_2] : memref<128x128xf32, #tpu.memory_space<vmem>>, vector<128x128xf32>
    %cst = arith.constant dense<0.000000e+00> : vector<16x128xf32>
    %2 = tpu.matmul %0, %1, %cst {dimension_numbers = #tpu.dot_dimension_numbers<[1], [0], [0], [1], [0, 0, 1, 1], [], []>} : vector<16x128xf32>, vector<128x128xf32>, vector<16x128xf32> -> vector<16x128xf32>
    %c0_3 = arith.constant 0 : index
    %c0_4 = arith.constant 0 : index
    %3 = vector.load %arg3[%c0_3, %c0_4] : memref<1x128xf32, #tpu.memory_space<vmem>>, vector<1x128xf32>
    %4 = vector.broadcast %3 : vector<1x128xf32> to vector<16x128xf32>
    %5 = arith.addf %2, %4 : vector<16x128xf32>
    %cst_5 = arith.constant 0.000000e+00 : f32
    %6 = vector.broadcast %cst_5 : f32 to vector<16x128xf32>
    %7 = arith.maximumf %5, %6 : vector<16x128xf32>
    %c0_6 = arith.constant 0 : index
    %c0_7 = arith.constant 0 : index
    %8 = vector.load %arg4[%c0_6, %c0_7] : memref<128x128xf32, #tpu.memory_space<vmem>>, vector<128x128xf32>
    %cst_8 = arith.constant dense<0.000000e+00> : vector<16x128xf32>
    %9 = tpu.matmul %7, %8, %cst_8 {dimension_numbers = #tpu.dot_dimension_numbers<[1], [0], [0], [1], [0, 0, 1, 1], [], []>} : vector<16x128xf32>, vector<128x128xf32>, vector<16x128xf32> -> vector<16x128xf32>
    %c0_9 = arith.constant 0 : index
    %c0_10 = arith.constant 0 : index
    %10 = vector.load %arg5[%c0_9, %c0_10] : memref<1x128xf32, #tpu.memory_space<vmem>>, vector<1x128xf32>
    %11 = vector.broadcast %10 : vector<1x128xf32> to vector<16x128xf32>
    %12 = arith.addf %9, %11 : vector<16x128xf32>
    %c0_11 = arith.constant 0 : index
    %c0_12 = arith.constant 0 : index
    %13 = vector.load %arg6[%c0_11, %c0_12] : memref<16x128xf32, #tpu.memory_space<vmem>>, vector<16x128xf32>
    tpu.vector_store %arg6[%c0_11, %c0_12], %12 {strides = array<i32>} : memref<16x128xf32, #tpu.memory_space<vmem>>, vector<16x128xf32>,
    return
  }
  func.func @transform_0(%arg0: i32) -> (i32, i32) {
    %c0_i32 = arith.constant 0 : i32
    %c0_i32_0 = arith.constant 0 : i32
    return %arg0, %c0_i32 : i32, i32
  }
  func.func @transform_1(%arg0: i32) -> (i32, i32) {
    %c0_i32 = arith.constant 0 : i32
    %c0_i32_0 = arith.constant 0 : i32
    %c0_i32_1 = arith.constant 0 : i32
    return %c0_i32, %c0_i32_0 : i32, i32
  }
  func.func @transform_2(%arg0: i32) -> (i32, i32) {
    %c0_i32 = arith.constant 0 : i32
    %c0_i32_0 = arith.constant 0 : i32
    %c0_i32_1 = arith.constant 0 : i32
    return %c0_i32, %c0_i32_0 : i32, i32
  }
  func.func @transform_3(%arg0: i32) -> (i32, i32) {
    %c0_i32 = arith.constant 0 : i32
    %c0_i32_0 = arith.constant 0 : i32
    %c0_i32_1 = arith.constant 0 : i32
    return %c0_i32, %c0_i32_0 : i32, i32
  }
  func.func @transform_4(%arg0: i32) -> (i32, i32) {
    %c0_i32 = arith.constant 0 : i32
    %c0_i32_0 = arith.constant 0 : i32
    %c0_i32_1 = arith.constant 0 : i32
    return %c0_i32, %c0_i32_0 : i32, i32
  }
  func.func @transform_5(%arg0: i32) -> (i32, i32) {
    %c0_i32 = arith.constant 0 : i32
    %c0_i32_0 = arith.constant 0 : i32
    return %arg0, %c0_i32 : i32, i32
  }
}

</mosaic_0001>

<bundles_post_ra>
// kernel: feed_forward.1
= control target key start
LH: loop header
LB: loop body
LE: loop exit
PB: predicated region body
PF: predicated region fallthrough
CT: control target
= control target key end

     0   :  { %10 = vsyncpa [#allocation3], 0  ;;  %s610_s0 = inlined_call_operand.vmem [shape: f32[16,128], index: 0, kind: input, shape index: {}]   ;;  %s611_s1 = inlined_call_operand.hbm [shape: f32[128,128], index: 1, kind: input, shape index: {}]   ;;  %s612_s2 = inlined_call_operand.vmem [shape: f32[1,128], index: 2, kind: input, shape index: {}]   ;;  %s613_s3 = inlined_call_operand.hbm [shape: f32[128,128], index: 3, kind: input, shape index: {}]   ;;  %s614_s4 = inlined_call_operand.vmem [shape: f32[1,128], index: 4, kind: input, shape index: {}]   ;;  %s615_s5 = inlined_call_operand.hbm [shape: f32[16,128], index: 5, kind: output, shape index: {}]  }
   0x1   :  { %11 = vsyncpa [#allocation6], 0 }
   0x2   :  { %12 = vsyncpa [#allocation4], 0  ;;  %s518_s18 = smov [#allocation2]   ;;  %s446_s22 = scalar_lea.hbm %s611_s1, 2048 }
   0x3   :  { %s20_s19 = sshll.u32 %s518_s18, 4  ;;  %p447_p0 = scmp.ne.s32.totalorder %s611_s1, %s446_s22  ;;  %s21_s19 = int_to_ptr.vmem [resolvable:$true] %s20_s19 }
   0x4   :  { %p450_p1 = scmp.lt.u32.totalorder %s446_s22, %s611_s1 }
   0x6   :  { %p452_p2 = pnand %p450_p1, %p447_p0 }
   0x8   :  { %455 = shalt.err (!%p452_p2)
}
   0x9   :  { %s456_s27 = scalar_lea.vmem %s21_s19, 2048  ;;  %p461_p4 = scmp.lt.s32.totalorder %s21_s19, %s21_s19 }
   0xa   :  { %p457_p3 = scmp.ne.s32.totalorder %s21_s19, %s456_s27  ;;  %p462_p5 = scmp.lt.s32.totalorder %s456_s27, %s456_s27 }
   0xc   :  { %p463_p6 = por %p462_p5, %p461_p4 }
   0xe   :  { %p464_p7 = pnand %p463_p6, %p457_p3 }
  0x10   :  { %467 = shalt.err (!%p464_p7)
}
  0x11   :  { %s519_s28 = smov 128   ;;  %s520_s29 = smov 8  }
  0x12   :  { %26 = dma.hbm_to_vmem [thread:$0]  %s611_s1, 2048, %s21_s19, [#allocation3], %s519_s28, %s519_s28, %s520_s29  }
  0x13   :  { %s521_s7 = smov [#allocation5]   ;;  %s468_s11 = scalar_lea.hbm %s613_s3, 2048 }
  0x14   :  { %s34_s8 = sshll.u32 %s521_s7, 4  ;;  %p469_p8 = scmp.ne.s32.totalorder %s613_s3, %s468_s11  ;;  %s35_s8 = int_to_ptr.vmem [resolvable:$true] %s34_s8 }
  0x15   :  { %p472_p9 = scmp.lt.u32.totalorder %s468_s11, %s613_s3 }
  0x17   :  { %p474_p10 = pnand %p472_p9, %p469_p8 }
  0x19   :  { %477 = shalt.err (!%p474_p10)
}
  0x1a   :  { %s478_s16 = scalar_lea.vmem %s35_s8, 2048  ;;  %p483_p12 = scmp.lt.s32.totalorder %s35_s8, %s35_s8 }
  0x1b   :  { %p479_p11 = scmp.ne.s32.totalorder %s35_s8, %s478_s16  ;;  %p484_p13 = scmp.lt.s32.totalorder %s478_s16, %s478_s16 }
  0x1d   :  { %p485_p0 = por %p484_p13, %p483_p12 }
  0x1f   :  { %p486_p1 = pnand %p485_p0, %p479_p11 }
  0x21   :  { %489 = shalt.err (!%p486_p1)
}
  0x22   :  { %40 = dma.hbm_to_vmem [thread:$0]  %s613_s3, 2048, %s35_s8, [#allocation6], %s519_s28, %s519_s28, %s520_s29  }
  0x23   :  { %512 = dma.done.wait [#allocation3], 2048  }
  0x24   :  { %513 = vsyncadd [#allocation3], 4294965248 }
  0x25   :  { %514 = dma.done.wait [#allocation6], 2048  }
  0x26   :  { %515 = vsyncadd [#allocation6], 4294965248  ;;  %v51_v0 = vld [vmem:[#allocation2] sm:$0xff]  ;;  %v52_v1 = vld [vmem:[#allocation2 + $0x8] sm:$0xff]  ;;  %s522_s24 = smov [#allocation7]  }
  0x27   :  { %v53_v2 = vld [vmem:[#allocation2 + $0x10] sm:$0xff]  ;;  %v377_v3 = vpack.c.bf16 %v52_v1, %v51_v0  ;;  %v54_v4 = vld [vmem:[#allocation2 + $0x18] sm:$0xff]  ;;  %v55_v6 = vld [vmem:[#allocation2 + $0x20] sm:$0xff]  ;;  %s256_s25 = sshll.u32 %s522_s24, 4  ;;  %s257_s25 = int_to_ptr.vmem [resolvable:$true] %s256_s25 }
  0x28   :  { %v381_v5 = vpack.c.bf16 %v54_v4, %v53_v2  ;;  %v56_v7 = vld [vmem:[#allocation2 + $0x28] sm:$0xff]  ;;  %v57_v9 = vld [vmem:[#allocation2 + $0x30] sm:$0xff]  ;;  %v58_v10 = vld [vmem:[#allocation2 + $0x38] sm:$0xff]  ;;  %p495_p3 = scmp.lt.s32.totalorder %s257_s25, %s257_s25 }
  0x29   :  { %378 = vmatprep.subr.bf16.mxu0 %v377_v3  ;;  %v385_v8 = vpack.c.bf16 %v56_v7, %v55_v6  ;;  %v49_v11 = vld [vmem:[%s610_s0] sm:$0xff]  ;;  %v152_v13 = vld [vmem:[#allocation5 + $0x8] sm:$0xff]  ;;  %v153_v14 = vld [vmem:[#allocation5 + $0x10] sm:$0xff]  ;;  %v389_v20 = vpack.c.bf16 %v58_v10, %v57_v9 }
  0x2a   :  { %380 = vmatpush3.bf16.msra.mxu0 %v377_v3  ;;  %339 = vmatprep.mubr.f32.mxu0 %v49_v11  ;;  %v151_v12 = vld [vmem:[#allocation5] sm:$0xff]  ;;  %v154_v16 = vld [vmem:[#allocation5 + $0x18] sm:$0xff]  ;;  %v156_v19 = vld [vmem:[#allocation5 + $0x28] sm:$0xff] }
  0x2b   :  { %382 = vmatprep.subr.bf16.mxu0 %v381_v5  ;;  %v409_v15 = vpack.c.bf16 %v152_v13, %v151_v12  ;;  %v413_v17 = vpack.c.bf16 %v154_v16, %v153_v14  ;;  %v155_v18 = vld [vmem:[#allocation5 + $0x20] sm:$0xff]  ;;  %v60_v22 = vld [vmem:[#allocation2 + $0x48] sm:$0xff]  ;;  %v157_v24 = vld [vmem:[#allocation5 + $0x30] sm:$0xff] }
  0x2c   :  { %v59_v21 = vld [vmem:[#allocation2 + $0x40] sm:$0xff]  ;;  %v417_v23 = vpack.c.bf16 %v156_v19, %v155_v18  ;;  %v158_v25 = vld [vmem:[#allocation5 + $0x38] sm:$0xff]  ;;  %v61_v27 = vld [vmem:[#allocation2 + $0x50] sm:$0xff] }
  0x2d   :  { %410 = vmatprep.subr.bf16.mxu1 %v409_v15  ;;  %v393_v26 = vpack.c.bf16 %v60_v22, %v59_v21  ;;  %v62_v28 = vld [vmem:[#allocation2 + $0x58] sm:$0xff]  ;;  %v421_v29 = vpack.c.bf16 %v158_v25, %v157_v24  ;;  %v159_v30 = vld [vmem:[#allocation5 + $0x40] sm:$0xff]  ;;  %v160_v31 = vld [vmem:[#allocation5 + $0x48] sm:$0xff] }
  0x2e   :  { %384 = vmatpush3.bf16.msra.mxu0 %v381_v5  ;;  %412 = vmatpush3.bf16.msra.mxu1 %v409_v15  ;;  %v397_v32 = vpack.c.bf16 %v62_v28, %v61_v27  ;;  %v63_v33 = vld [vmem:[#allocation2 + $0x60] sm:$0xff]  ;;  %v64_v34 = vld [vmem:[#allocation2 + $0x68] sm:$0xff]  ;;  %v425_v35 = vpack.c.bf16 %v160_v31, %v159_v30  ;;  %v161_v36 = vld [vmem:[#allocation5 + $0x50] sm:$0xff] }
  0x2f   :  { %386 = vmatprep.subr.bf16.mxu0 %v385_v8  ;;  %414 = vmatprep.subr.bf16.mxu1 %v413_v17  ;;  %v162_v37 = vld [vmem:[#allocation5 + $0x58] sm:$0xff]  ;;  %v401_v38 = vpack.c.bf16 %v64_v34, %v63_v33  ;;  %v65_v39 = vld [vmem:[#allocation2 + $0x70] sm:$0xff]  ;;  %v163_v42 = vld [vmem:[#allocation5 + $0x60] sm:$0xff] }
  0x30   :  { %v66_v40 = vld [vmem:[#allocation2 + $0x78] sm:$0xff]  ;;  %v429_v41 = vpack.c.bf16 %v162_v37, %v161_v36  ;;  %v164_v43 = vld [vmem:[#allocation5 + $0x68] sm:$0xff]  ;;  %v165_v47 = vld [vmem:[#allocation5 + $0x70] sm:$0xff] }
  0x31   :  { %v405_v44 = vpack.c.bf16 %v66_v40, %v65_v39  ;;  %v433_v45 = vpack.c.bf16 %v164_v43, %v163_v42  ;;  %v50_v46 = vld [vmem:[%s610_s0 + $0x8] sm:$0xff]  ;;  %v166_v48 = vld [vmem:[#allocation5 + $0x78] sm:$0xff]  ;;  %v269_v50 = vld [vmem:[%s612_s2] ss:$0 sm:$0xff]  ;;  %s490_s2 = scalar_lea.vmem %s257_s25, 256 }
  0x32   :  { %388 = vmatpush3.bf16.msra.mxu0 %v385_v8  ;;  %416 = vmatpush3.bf16.msra.mxu1 %v413_v17  ;;  %v437_v49 = vpack.c.bf16 %v166_v48, %v165_v47  ;;  %v270_v57 = vld [vmem:[%s614_s4] ss:$0 sm:$0xff]  ;;  %p491_p2 = scmp.ne.s32.totalorder %s257_s25, %s490_s2  ;;  %p496_p4 = scmp.lt.s32.totalorder %s490_s2, %s490_s2 }
  0x33   :  { %390 = vmatprep.subr.bf16.mxu0 %v389_v20  ;;  %418 = vmatprep.subr.bf16.mxu1 %v417_v23 }
  0x34   :  { %p497_p5 = por %p496_p4, %p495_p3 }
  0x36   :  { %392 = vmatpush3.bf16.msra.mxu0 %v389_v20  ;;  %420 = vmatpush3.bf16.msra.mxu1 %v417_v23  ;;  %p498_p6 = pnand %p497_p5, %p491_p2 }
  0x37   :  { %394 = vmatprep.subr.bf16.mxu0 %v393_v26  ;;  %422 = vmatprep.subr.bf16.mxu1 %v421_v29 }
  0x3a   :  { %396 = vmatpush3.bf16.msra.mxu0 %v393_v26  ;;  %424 = vmatpush3.bf16.msra.mxu1 %v421_v29 }
  0x3b   :  { %398 = vmatprep.subr.bf16.mxu0 %v397_v32  ;;  %426 = vmatprep.subr.bf16.mxu1 %v425_v35 }
  0x3e   :  { %400 = vmatpush3.bf16.msra.mxu0 %v397_v32  ;;  %428 = vmatpush3.bf16.msra.mxu1 %v425_v35 }
  0x3f   :  { %402 = vmatprep.subr.bf16.mxu0 %v401_v38  ;;  %430 = vmatprep.subr.bf16.mxu1 %v429_v41 }
  0x42   :  { %404 = vmatpush3.bf16.msra.mxu0 %v401_v38  ;;  %432 = vmatpush3.bf16.msra.mxu1 %v429_v41 }
  0x43   :  { %406 = vmatprep.subr.bf16.mxu0 %v405_v44  ;;  %434 = vmatprep.subr.bf16.mxu1 %v433_v45 }
  0x46   :  { %408 = vmatpush3.bf16.msra.mxu0 %v405_v44  ;;  %436 = vmatpush3.bf16.msra.mxu1 %v433_v45 }
  0x47   :  { %438 = vmatprep.subr.bf16.mxu1 %v437_v49 }
  0x49   :  { %340 = vmatmul.mubr.f32.vlgmr.msra.gmra.mrb[0].mxu0 %v50_v46 }
  0x4a   :  { %440 = vmatpush3.bf16.msra.mxu1 %v437_v49 }
 0x11c   :  { %v341_v51 = vpop.f32.mrb[0].mxu0 }
 0x11d   :  { %v146_v52 = vadd.f32 %v341_v51, %v269_v50  ;;  %v140_v53 = vpop.f32.mrb[1].mxu0 }
 0x11e   :  { %v141_v54 = vadd.f32 %v269_v50, %v140_v53 }
 0x11f   :  { %v150_v56 = vmax.f32 %v146_v52, 0.0 }
 0x120   :  { %v149_v55 = vmax.f32 %v141_v54, 0.0 }
 0x122   :  { %374 = vmatprep.mubr.f32.mxu1 %v149_v55 }
 0x123   :  { %375 = vmatmul.mubr.f32.vlgmr.msra.gmra.mrb[0].mxu1 %v150_v56 }
 0x1f6   :  { %v376_v58 = vpop.f32.mrb[0].mxu1 }
 0x1f7   :  { %v246_v59 = vadd.f32 %v376_v58, %v270_v57  ;;  %v240_v60 = vpop.f32.mrb[1].mxu1 }
 0x1f8   :  { %v241_v61 = vadd.f32 %v270_v57, %v240_v60 }
 0x1f9   :  { %250 = vst [vmem:[#allocation7 + $0x8] sm:$0xff] %v246_v59 }
 0x1fa   :  { %249 = vst [vmem:[#allocation7] sm:$0xff] %v241_v61 }
 0x1fb   :  { %501 = shalt.err (!%p498_p6)
}
 0x1fc   :  { %s502_s4 = scalar_lea.hbm %s615_s5, 256 }
 0x1fd   :  { %p503_p7 = scmp.ne.s32.totalorder %s615_s5, %s502_s4  ;;  %p506_p8 = scmp.lt.u32.totalorder %s502_s4, %s615_s5 }
 0x1ff   :  { %p508_p9 = pnand %p506_p8, %p503_p7 }
 0x201   :  { %511 = shalt.err (!%p508_p9)
}
 0x202   :  { %262 = dma.vmem_to_hbm [thread:$0]  %s257_s25, 256, %s615_s5, [#allocation4], %s519_s28, %s519_s28, %s520_s29  }
 0x203   :  { %516 = dma.done.wait [#allocation4], 256  }
 0x204   :  { %517 = vsyncadd [#allocation4], 4294967040 }
 0x205   :  { %266 = vsyncpa [#allocation3], 1 }
 0x206   :  { %267 = vsyncpa [#allocation6], 1 }
 0x207   :  { %268 = vsyncpa [#allocation4], 1 }

</bundles_post_ra>
